<compile_context>
chip_gen: v5e
topology: v5e:2x2
jax: 0.10.0
libtpu: 0.0.40
codegen_flags: <defaults>
</compile_context>

<pallas_src>
import math
import functools

import jax
import jax.numpy as jnp
from jax.experimental import pallas as pl
from jax.experimental.pallas import tpu as pltpu


# ---------------------------------------------------------------------------
# Activations (resolved statically at trace time; all f32 VPU/EUP math).
# ---------------------------------------------------------------------------
def _make_activation(name):
    if name == "relu":
        return lambda v: jnp.maximum(v, 0.0)
    if name == "relu6":
        return lambda v: jnp.clip(v, 0.0, 6.0)
    if name == "hardtanh":
        return lambda v: jnp.clip(v, -1.0, 1.0)
    if name == "sigmoid":
        return lambda v: jax.nn.sigmoid(v)
    if name == "tanh":
        return lambda v: jnp.tanh(v)
    if name == "tanhshrink":
        return lambda v: v - jnp.tanh(v)
    if name == "hardshrink":
        return lambda v: jnp.where(jnp.abs(v) > 0.5, v, 0.0)
    if name == "leakyrelu":
        return lambda v: jnp.where(v >= 0.0, v, 0.01 * v)
    if name == "softshrink":
        return lambda v: jnp.sign(v) * jnp.maximum(jnp.abs(v) - 0.5, 0.0)
    if name == "softsign":
        return lambda v: v / (1.0 + jnp.abs(v))
    if name == "softplus":
        return lambda v: jax.nn.softplus(v)
    if name == "elu":
        # clamp exp argument so the unselected branch never produces inf
        return lambda v: jnp.where(v > 0.0, v, jnp.exp(jnp.minimum(v, 0.0)) - 1.0)
    if name == "selu":
        return lambda v: 1.0507009873554805 * jnp.where(
            v > 0.0, v, 1.6732632423543772 * (jnp.exp(jnp.minimum(v, 0.0)) - 1.0))
    # TODO(synk): nn.PReLU has a learnable slope; fixed at PyTorch's default init 0.25.
    if name == "prelu":
        return lambda v: jnp.where(v >= 0.0, v, 0.25 * v)
    raise ValueError("[!] Invalid activation function.")


# ---------------------------------------------------------------------------
# Kernel: activations carried as [features, batch_tile]; params in one slab.
# Slab column layout (E = encoding_dim, I = input_dim):
#   [0, I)            columns of W1  ([E, I], PyTorch [out, in])
#   [I, I+E)          columns of W2
#   [I+E, I+2E)       columns of W3
#   [I+2E, I+3E)      columns of W4
#   [I+3E, 2I+3E)     columns of W5^T ([E, I])
#   then 1 column each for b1, b2, b3, b4, b5 (b5 padded to E rows)
# ---------------------------------------------------------------------------
def mlp_kernel(x_ref, p_ref, o_ref, *, activation, enc_dim, in_dim):
    E, I = enc_dim, in_dim
    TB = x_ref.shape[-1]
    act = _make_activation(activation)

    w1_o = 0
    w2_o = I
    w3_o = I + E
    w4_o = I + 2 * E
    w5_o = I + 3 * E
    b1_o = w5_o + I
    b2_o = b1_o + 1
    b3_o = b2_o + 1
    b4_o = b3_o + 1
    b5_o = b4_o + 1

    def dense(h_in, w_off, b_off, k_dim):
        # out[j, :] = b[j] + sum_k W[j, k] * h_in[k, :]
        # Unrolled broadcast multiply-adds on the VPU (no MXU for 8-wide layers).
        acc = jnp.broadcast_to(p_ref[:, b_off:b_off + 1], (E, TB))
        for k in range(k_dim):
            acc = acc + p_ref[:, w_off + k:w_off + k + 1] * h_in[k:k + 1, :]
        return acc

    x = x_ref[...]                                   # [I, TB]
    h = act(dense(x, w1_o, b1_o, I))                 # [E, TB] (outer product, I == 1)
    h = act(dense(h, w2_o, b2_o, E))
    h = act(dense(h, w3_o, b3_o, E))
    h = act(dense(h, w4_o, b4_o, E))

    # Output layer: out[i, :] = sum_k W5[i, k] * h[k, :] + b5[i]
    rows = []
    for i in range(I):
        prod = p_ref[:, w5_o + i:w5_o + i + 1] * h            # [E, TB] (VPU)
        r = jnp.sum(prod, axis=0, keepdims=True)              # [1, TB] (XLU sublane reduce)
        rows.append(r + p_ref[i:i + 1, b5_o:b5_o + 1])
    out = rows[0] if I == 1 else jnp.concatenate(rows, axis=0)
    o_ref[...] = out.astype(o_ref.dtype)              # lane-dense unmasked store


# ---------------------------------------------------------------------------
# Host-side packing / wrapper
# ---------------------------------------------------------------------------
def pack_params(params, enc_dim, in_dim, pad_lanes=128):
    """Pack (w1,b1,...,w5,b5) [PyTorch layout: w [out,in], b [out]] into one
    [enc_dim, pad_lanes] f32 slab -> a single tiny DMA."""
    w1, b1, w2, b2, w3, b3, w4, b4, w5, b5 = params
    E, I = enc_dim, in_dim
    b5_col = jnp.zeros((E, 1), jnp.float32).at[:I, 0].set(b5.astype(jnp.float32))
    cols = [w1, w2, w3, w4, w5.T,
            b1[:, None], b2[:, None], b3[:, None], b4[:, None], b5_col]
    slab = jnp.concatenate([c.astype(jnp.float32) for c in cols], axis=1)
    pad = (-slab.shape[1]) % pad_lanes
    if pad:
        slab = jnp.pad(slab, ((0, 0), (0, pad)))
    return slab


def mlp_forward(x, params, activation="relu", tile_b=128):
    """x: [B, input_dim] float32. Returns [B, input_dim] (matches MLP.forward).
    For large batches bump tile_b to 512-2048 (budget against 64 MiB VMEM on v7x)."""
    B, I = x.shape
    E = params[0].shape[0]            # w1 is [E, I]
    assert E % 8 == 0, "encoding_dim must be a multiple of 8 for the packed slab"

    # Batch on the lane axis, zero-padded to a lane-dense multiple of tile_b.
    B_pad = ((max(B, tile_b) + tile_b - 1) // tile_b) * tile_b
    x_t = jnp.zeros((I, B_pad), jnp.float32).at[:, :B].set(x.T.astype(jnp.float32))

    slab = pack_params(params, E, I)  # [E, 128]
    n_tiles = B_pad // tile_b

    out_t = pl.pallas_call(
        functools.partial(mlp_kernel, activation=activation, enc_dim=E, in_dim=I),
        out_shape=jax.ShapeDtypeStruct((I, B_pad), jnp.float32),
        grid=(n_tiles,),
        in_specs=[
            pl.BlockSpec((I, tile_b), lambda i: (0, i)),          # batch tile of x
            pl.BlockSpec((E, slab.shape[1]), lambda i: (0, 0)),   # params: constant index -> resident
        ],
        out_specs=pl.BlockSpec((I, tile_b), lambda i: (0, i)),
        compiler_params=pltpu.CompilerParams(
            dimension_semantics=("parallel",),        # megacore sharding on v7x
            vmem_limit_bytes=32 * 1024 * 1024,        # explicit, safe on v5e/v6e/v7x
        ),
    )(x_t, slab)
    return out_t[:, :B].T


# ---------------------------------------------------------------------------
# Deterministic init mirroring kaiming_uniform_(a=sqrt(5)) for nn.Linear:
# weight, bias ~ U(-1/sqrt(fan_in), 1/sqrt(fan_in)); weights in [out, in] layout.
# ---------------------------------------------------------------------------
def init_params(key, input_dim=1, encoding_dim=8):
    dims = [(input_dim, encoding_dim),
            (encoding_dim, encoding_dim),
            (encoding_dim, encoding_dim),
            (encoding_dim, encoding_dim),
            (encoding_dim, input_dim)]
    params = []
    for (fan_in, fan_out) in dims:
        key, kw, kb = jax.random.split(key, 3)
        bound = 1.0 / math.sqrt(fan_in)
        w = jax.random.uniform(kw, (fan_out, fan_in), jnp.float32, -bound, bound)
        b = jax.random.uniform(kb, (fan_out,), jnp.float32, -bound, bound)
        params += [w, b]
    return tuple(params)


def mlp_reference(x, params, activation="relu"):
    act = _make_activation(activation)
    w1, b1, w2, b2, w3, b3, w4, b4, w5, b5 = params
    dot = functools.partial(jnp.dot, precision=jax.lax.Precision.HIGHEST)
    h = act(dot(x, w1.T) + b1)
    h = act(dot(h, w2.T) + b2)
    h = act(dot(h, w3.T) + b3)
    h = act(dot(h, w4.T) + b4)
    return dot(h, w5.T) + b5


if __name__ == "__main__":
    key = jax.random.PRNGKey(0)
    key, kx = jax.random.split(key)

    input_dim, encoding_dim, batch = 1, 8, 200   # batch not a multiple of 128 on purpose
    x = jax.random.normal(kx, (batch, input_dim), jnp.float32)
    params = init_params(key, input_dim=input_dim, encoding_dim=encoding_dim)

    for activation in ("relu", "tanh", "selu"):
        out = jax.block_until_ready(mlp_forward(x, params, activation=activation))
        ref = mlp_reference(x, params, activation=activation)
        assert out.shape == (batch, input_dim)
        assert jnp.allclose(out, ref, atol=1e-5, rtol=1e-5), f"mismatch vs reference ({activation})"

    print("KERNEL_OK")
</pallas_src>

<mosaic_0001>
module attributes {stable_mosaic.version = 11 : i64} {
  func.func @mlp_kernel(%arg0: i32, %arg1: memref<1x128xf32, #tpu.memory_space<vmem>>, %arg2: memref<8x128xf32, #tpu.memory_space<vmem>>, %arg3: memref<1x128xf32, #tpu.memory_space<vmem>>) attributes {dimension_semantics = [#tpu.dimension_semantics<parallel>], iteration_bounds = array<i64: 2>, scalar_prefetch = 0 : i64, scratch_operands = 0 : i64, tpu.core_type = #tpu.core_type<tc>, window_params = [{transform_indices = @transform_0, window_bounds = array<i64: 1, 128>}, {pipeline_mode = #tpu.pipeline_mode<synchronous>, transform_indices = @transform_1, window_bounds = array<i64: 8, 128>}, {transform_indices = @transform_2, window_bounds = array<i64: 1, 128>}]} {
    %c0 = arith.constant 0 : index
    %c0_0 = arith.constant 0 : index
    %0 = vector.load %arg1[%c0, %c0_0] : memref<1x128xf32, #tpu.memory_space<vmem>>, vector<1x128xf32>
    %c0_1 = arith.constant 0 : index
    %c26 = arith.constant 26 : index
    %1 = vector.load %arg2[%c0_1, %c26] : memref<8x128xf32, #tpu.memory_space<vmem>>, vector<8x1xf32>
    %2 = vector.shape_cast %1 : vector<8x1xf32> to vector<8x1xf32>
    %3 = vector.broadcast %2 : vector<8x1xf32> to vector<8x128xf32>
    %c0_2 = arith.constant 0 : index
    %c0_3 = arith.constant 0 : index
    %4 = vector.load %arg2[%c0_2, %c0_3] : memref<8x128xf32, #tpu.memory_space<vmem>>, vector<8x1xf32>
    %5 = vector.broadcast %4 : vector<8x1xf32> to vector<8x128xf32>
    %6 = vector.broadcast %0 : vector<1x128xf32> to vector<8x128xf32>
    %7 = arith.mulf %5, %6 : vector<8x128xf32>
    %8 = arith.addf %3, %7 : vector<8x128xf32>
    %cst = arith.constant 0.000000e+00 : f32
    %9 = vector.broadcast %cst : f32 to vector<8x128xf32>
    %10 = arith.maximumf %8, %9 : vector<8x128xf32>
    %c0_4 = arith.constant 0 : index
    %c27 = arith.constant 27 : index
    %11 = vector.load %arg2[%c0_4, %c27] : memref<8x128xf32, #tpu.memory_space<vmem>>, vector<8x1xf32>
    %12 = vector.shape_cast %11 : vector<8x1xf32> to vector<8x1xf32>
    %13 = vector.broadcast %12 : vector<8x1xf32> to vector<8x128xf32>
    %c0_5 = arith.constant 0 : index
    %c1 = arith.constant 1 : index
    %14 = vector.load %arg2[%c0_5, %c1] : memref<8x128xf32, #tpu.memory_space<vmem>>, vector<8x1xf32>
    %15 = vector.extract_strided_slice %10 {offsets = [0, 0], sizes = [1, 128], strides = [1, 1]} : vector<8x128xf32> to vector<1x128xf32>
    %16 = vector.broadcast %14 : vector<8x1xf32> to vector<8x128xf32>
    %17 = vector.broadcast %15 : vector<1x128xf32> to vector<8x128xf32>
    %18 = arith.mulf %16, %17 : vector<8x128xf32>
    %19 = arith.addf %13, %18 : vector<8x128xf32>
    %c0_6 = arith.constant 0 : index
    %c2 = arith.constant 2 : index
    %20 = vector.load %arg2[%c0_6, %c2] : memref<8x128xf32, #tpu.memory_space<vmem>>, vector<8x1xf32>
    %21 = vector.extract_strided_slice %10 {offsets = [1, 0], sizes = [1, 128], strides = [1, 1]} : vector<8x128xf32> to vector<1x128xf32>
    %22 = vector.broadcast %20 : vector<8x1xf32> to vector<8x128xf32>
    %23 = vector.broadcast %21 : vector<1x128xf32> to vector<8x128xf32>
    %24 = arith.mulf %22, %23 : vector<8x128xf32>
    %25 = arith.addf %19, %24 : vector<8x128xf32>
    %c0_7 = arith.constant 0 : index
    %c3 = arith.constant 3 : index
    %26 = vector.load %arg2[%c0_7, %c3] : memref<8x128xf32, #tpu.memory_space<vmem>>, vector<8x1xf32>
    %27 = vector.extract_strided_slice %10 {offsets = [2, 0], sizes = [1, 128], strides = [1, 1]} : vector<8x128xf32> to vector<1x128xf32>
    %28 = vector.broadcast %26 : vector<8x1xf32> to vector<8x128xf32>
    %29 = vector.broadcast %27 : vector<1x128xf32> to vector<8x128xf32>
    %30 = arith.mulf %28, %29 : vector<8x128xf32>
    %31 = arith.addf %25, %30 : vector<8x128xf32>
    %c0_8 = arith.constant 0 : index
    %c4 = arith.constant 4 : index
    %32 = vector.load %arg2[%c0_8, %c4] : memref<8x128xf32, #tpu.memory_space<vmem>>, vector<8x1xf32>
    %33 = vector.extract_strided_slice %10 {offsets = [3, 0], sizes = [1, 128], strides = [1, 1]} : vector<8x128xf32> to vector<1x128xf32>
    %34 = vector.broadcast %32 : vector<8x1xf32> to vector<8x128xf32>
    %35 = vector.broadcast %33 : vector<1x128xf32> to vector<8x128xf32>
    %36 = arith.mulf %34, %35 : vector<8x128xf32>
    %37 = arith.addf %31, %36 : vector<8x128xf32>
    %c0_9 = arith.constant 0 : index
    %c5 = arith.constant 5 : index
    %38 = vector.load %arg2[%c0_9, %c5] : memref<8x128xf32, #tpu.memory_space<vmem>>, vector<8x1xf32>
    %39 = vector.extract_strided_slice %10 {offsets = [4, 0], sizes = [1, 128], strides = [1, 1]} : vector<8x128xf32> to vector<1x128xf32>
    %40 = vector.broadcast %38 : vector<8x1xf32> to vector<8x128xf32>
    %41 = vector.broadcast %39 : vector<1x128xf32> to vector<8x128xf32>
    %42 = arith.mulf %40, %41 : vector<8x128xf32>
    %43 = arith.addf %37, %42 : vector<8x128xf32>
    %c0_10 = arith.constant 0 : index
    %c6 = arith.constant 6 : index
    %44 = vector.load %arg2[%c0_10, %c6] : memref<8x128xf32, #tpu.memory_space<vmem>>, vector<8x1xf32>
    %45 = vector.extract_strided_slice %10 {offsets = [5, 0], sizes = [1, 128], strides = [1, 1]} : vector<8x128xf32> to vector<1x128xf32>
    %46 = vector.broadcast %44 : vector<8x1xf32> to vector<8x128xf32>
    %47 = vector.broadcast %45 : vector<1x128xf32> to vector<8x128xf32>
    %48 = arith.mulf %46, %47 : vector<8x128xf32>
    %49 = arith.addf %43, %48 : vector<8x128xf32>
    %c0_11 = arith.constant 0 : index
    %c7 = arith.constant 7 : index
    %50 = vector.load %arg2[%c0_11, %c7] : memref<8x128xf32, #tpu.memory_space<vmem>>, vector<8x1xf32>
    %51 = vector.extract_strided_slice %10 {offsets = [6, 0], sizes = [1, 128], strides = [1, 1]} : vector<8x128xf32> to vector<1x128xf32>
    %52 = vector.broadcast %50 : vector<8x1xf32> to vector<8x128xf32>
    %53 = vector.broadcast %51 : vector<1x128xf32> to vector<8x128xf32>
    %54 = arith.mulf %52, %53 : vector<8x128xf32>
    %55 = arith.addf %49, %54 : vector<8x128xf32>
    %c0_12 = arith.constant 0 : index
    %c8 = arith.constant 8 : index
    %56 = vector.load %arg2[%c0_12, %c8] : memref<8x128xf32, #tpu.memory_space<vmem>>, vector<8x1xf32>
    %57 = vector.extract_strided_slice %10 {offsets = [7, 0], sizes = [1, 128], strides = [1, 1]} : vector<8x128xf32> to vector<1x128xf32>
    %58 = vector.broadcast %56 : vector<8x1xf32> to vector<8x128xf32>
    %59 = vector.broadcast %57 : vector<1x128xf32> to vector<8x128xf32>
    %60 = arith.mulf %58, %59 : vector<8x128xf32>
    %61 = arith.addf %55, %60 : vector<8x128xf32>
    %cst_13 = arith.constant 0.000000e+00 : f32
    %62 = vector.broadcast %cst_13 : f32 to vector<8x128xf32>
    %63 = arith.maximumf %61, %62 : vector<8x128xf32>
    %c0_14 = arith.constant 0 : index
    %c28 = arith.constant 28 : index
    %64 = vector.load %arg2[%c0_14, %c28] : memref<8x128xf32, #tpu.memory_space<vmem>>, vector<8x1xf32>
    %65 = vector.shape_cast %64 : vector<8x1xf32> to vector<8x1xf32>
    %66 = vector.broadcast %65 : vector<8x1xf32> to vector<8x128xf32>
    %c0_15 = arith.constant 0 : index
    %c9 = arith.constant 9 : index
    %67 = vector.load %arg2[%c0_15, %c9] : memref<8x128xf32, #tpu.memory_space<vmem>>, vector<8x1xf32>
    %68 = vector.extract_strided_slice %63 {offsets = [0, 0], sizes = [1, 128], strides = [1, 1]} : vector<8x128xf32> to vector<1x128xf32>
    %69 = vector.broadcast %67 : vector<8x1xf32> to vector<8x128xf32>
    %70 = vector.broadcast %68 : vector<1x128xf32> to vector<8x128xf32>
    %71 = arith.mulf %69, %70 : vector<8x128xf32>
    %72 = arith.addf %66, %71 : vector<8x128xf32>
    %c0_16 = arith.constant 0 : index
    %c10 = arith.constant 10 : index
    %73 = vector.load %arg2[%c0_16, %c10] : memref<8x128xf32, #tpu.memory_space<vmem>>, vector<8x1xf32>
    %74 = vector.extract_strided_slice %63 {offsets = [1, 0], sizes = [1, 128], strides = [1, 1]} : vector<8x128xf32> to vector<1x128xf32>
    %75 = vector.broadcast %73 : vector<8x1xf32> to vector<8x128xf32>
    %76 = vector.broadcast %74 : vector<1x128xf32> to vector<8x128xf32>
    %77 = arith.mulf %75, %76 : vector<8x128xf32>
    %78 = arith.addf %72, %77 : vector<8x128xf32>
    %c0_17 = arith.constant 0 : index
    %c11 = arith.constant 11 : index
    %79 = vector.load %arg2[%c0_17, %c11] : memref<8x128xf32, #tpu.memory_space<vmem>>, vector<8x1xf32>
    %80 = vector.extract_strided_slice %63 {offsets = [2, 0], sizes = [1, 128], strides = [1, 1]} : vector<8x128xf32> to vector<1x128xf32>
    %81 = vector.broadcast %79 : vector<8x1xf32> to vector<8x128xf32>
    %82 = vector.broadcast %80 : vector<1x128xf32> to vector<8x128xf32>
    %83 = arith.mulf %81, %82 : vector<8x128xf32>
    %84 = arith.addf %78, %83 : vector<8x128xf32>
    %c0_18 = arith.constant 0 : index
    %c12 = arith.constant 12 : index
    %85 = vector.load %arg2[%c0_18, %c12] : memref<8x128xf32, #tpu.memory_space<vmem>>, vector<8x1xf32>
    %86 = vector.extract_strided_slice %63 {offsets = [3, 0], sizes = [1, 128], strides = [1, 1]} : vector<8x128xf32> to vector<1x128xf32>
    %87 = vector.broadcast %85 : vector<8x1xf32> to vector<8x128xf32>
    %88 = vector.broadcast %86 : vector<1x128xf32> to vector<8x128xf32>
    %89 = arith.mulf %87, %88 : vector<8x128xf32>
    %90 = arith.addf %84, %89 : vector<8x128xf32>
    %c0_19 = arith.constant 0 : index
    %c13 = arith.constant 13 : index
    %91 = vector.load %arg2[%c0_19, %c13] : memref<8x128xf32, #tpu.memory_space<vmem>>, vector<8x1xf32>
    %92 = vector.extract_strided_slice %63 {offsets = [4, 0], sizes = [1, 128], strides = [1, 1]} : vector<8x128xf32> to vector<1x128xf32>
    %93 = vector.broadcast %91 : vector<8x1xf32> to vector<8x128xf32>
    %94 = vector.broadcast %92 : vector<1x128xf32> to vector<8x128xf32>
    %95 = arith.mulf %93, %94 : vector<8x128xf32>
    %96 = arith.addf %90, %95 : vector<8x128xf32>
    %c0_20 = arith.constant 0 : index
    %c14 = arith.constant 14 : index
    %97 = vector.load %arg2[%c0_20, %c14] : memref<8x128xf32, #tpu.memory_space<vmem>>, vector<8x1xf32>
    %98 = vector.extract_strided_slice %63 {offsets = [5, 0], sizes = [1, 128], strides = [1, 1]} : vector<8x128xf32> to vector<1x128xf32>
    %99 = vector.broadcast %97 : vector<8x1xf32> to vector<8x128xf32>
    %100 = vector.broadcast %98 : vector<1x128xf32> to vector<8x128xf32>
    %101 = arith.mulf %99, %100 : vector<8x128xf32>
    %102 = arith.addf %96, %101 : vector<8x128xf32>
    %c0_21 = arith.constant 0 : index
    %c15 = arith.constant 15 : index
    %103 = vector.load %arg2[%c0_21, %c15] : memref<8x128xf32, #tpu.memory_space<vmem>>, vector<8x1xf32>
    %104 = vector.extract_strided_slice %63 {offsets = [6, 0], sizes = [1, 128], strides = [1, 1]} : vector<8x128xf32> to vector<1x128xf32>
    %105 = vector.broadcast %103 : vector<8x1xf32> to vector<8x128xf32>
    %106 = vector.broadcast %104 : vector<1x128xf32> to vector<8x128xf32>
    %107 = arith.mulf %105, %106 : vector<8x128xf32>
    %108 = arith.addf %102, %107 : vector<8x128xf32>
    %c0_22 = arith.constant 0 : index
    %c16 = arith.constant 16 : index
    %109 = vector.load %arg2[%c0_22, %c16] : memref<8x128xf32, #tpu.memory_space<vmem>>, vector<8x1xf32>
    %110 = vector.extract_strided_slice %63 {offsets = [7, 0], sizes = [1, 128], strides = [1, 1]} : vector<8x128xf32> to vector<1x128xf32>
    %111 = vector.broadcast %109 : vector<8x1xf32> to vector<8x128xf32>
    %112 = vector.broadcast %110 : vector<1x128xf32> to vector<8x128xf32>
    %113 = arith.mulf %111, %112 : vector<8x128xf32>
    %114 = arith.addf %108, %113 : vector<8x128xf32>
    %cst_23 = arith.constant 0.000000e+00 : f32
    %115 = vector.broadcast %cst_23 : f32 to vector<8x128xf32>
    %116 = arith.maximumf %114, %115 : vector<8x128xf32>
    %c0_24 = arith.constant 0 : index
    %c29 = arith.constant 29 : index
    %117 = vector.load %arg2[%c0_24, %c29] : memref<8x128xf32, #tpu.memory_space<vmem>>, vector<8x1xf32>
    %118 = vector.shape_cast %117 : vector<8x1xf32> to vector<8x1xf32>
    %119 = vector.broadcast %118 : vector<8x1xf32> to vector<8x128xf32>
    %c0_25 = arith.constant 0 : index
    %c17 = arith.constant 17 : index
    %120 = vector.load %arg2[%c0_25, %c17] : memref<8x128xf32, #tpu.memory_space<vmem>>, vector<8x1xf32>
    %121 = vector.extract_strided_slice %116 {offsets = [0, 0], sizes = [1, 128], strides = [1, 1]} : vector<8x128xf32> to vector<1x128xf32>
    %122 = vector.broadcast %120 : vector<8x1xf32> to vector<8x128xf32>
    %123 = vector.broadcast %121 : vector<1x128xf32> to vector<8x128xf32>
    %124 = arith.mulf %122, %123 : vector<8x128xf32>
    %125 = arith.addf %119, %124 : vector<8x128xf32>
    %c0_26 = arith.constant 0 : index
    %c18 = arith.constant 18 : index
    %126 = vector.load %arg2[%c0_26, %c18] : memref<8x128xf32, #tpu.memory_space<vmem>>, vector<8x1xf32>
    %127 = vector.extract_strided_slice %116 {offsets = [1, 0], sizes = [1, 128], strides = [1, 1]} : vector<8x128xf32> to vector<1x128xf32>
    %128 = vector.broadcast %126 : vector<8x1xf32> to vector<8x128xf32>
    %129 = vector.broadcast %127 : vector<1x128xf32> to vector<8x128xf32>
    %130 = arith.mulf %128, %129 : vector<8x128xf32>
    %131 = arith.addf %125, %130 : vector<8x128xf32>
    %c0_27 = arith.constant 0 : index
    %c19 = arith.constant 19 : index
    %132 = vector.load %arg2[%c0_27, %c19] : memref<8x128xf32, #tpu.memory_space<vmem>>, vector<8x1xf32>
    %133 = vector.extract_strided_slice %116 {offsets = [2, 0], sizes = [1, 128], strides = [1, 1]} : vector<8x128xf32> to vector<1x128xf32>
    %134 = vector.broadcast %132 : vector<8x1xf32> to vector<8x128xf32>
    %135 = vector.broadcast %133 : vector<1x128xf32> to vector<8x128xf32>
    %136 = arith.mulf %134, %135 : vector<8x128xf32>
    %137 = arith.addf %131, %136 : vector<8x128xf32>
    %c0_28 = arith.constant 0 : index
    %c20 = arith.constant 20 : index
    %138 = vector.load %arg2[%c0_28, %c20] : memref<8x128xf32, #tpu.memory_space<vmem>>, vector<8x1xf32>
    %139 = vector.extract_strided_slice %116 {offsets = [3, 0], sizes = [1, 128], strides = [1, 1]} : vector<8x128xf32> to vector<1x128xf32>
    %140 = vector.broadcast %138 : vector<8x1xf32> to vector<8x128xf32>
    %141 = vector.broadcast %139 : vector<1x128xf32> to vector<8x128xf32>
    %142 = arith.mulf %140, %141 : vector<8x128xf32>
    %143 = arith.addf %137, %142 : vector<8x128xf32>
    %c0_29 = arith.constant 0 : index
    %c21 = arith.constant 21 : index
    %144 = vector.load %arg2[%c0_29, %c21] : memref<8x128xf32, #tpu.memory_space<vmem>>, vector<8x1xf32>
    %145 = vector.extract_strided_slice %116 {offsets = [4, 0], sizes = [1, 128], strides = [1, 1]} : vector<8x128xf32> to vector<1x128xf32>
    %146 = vector.broadcast %144 : vector<8x1xf32> to vector<8x128xf32>
    %147 = vector.broadcast %145 : vector<1x128xf32> to vector<8x128xf32>
    %148 = arith.mulf %146, %147 : vector<8x128xf32>
    %149 = arith.addf %143, %148 : vector<8x128xf32>
    %c0_30 = arith.constant 0 : index
    %c22 = arith.constant 22 : index
    %150 = vector.load %arg2[%c0_30, %c22] : memref<8x128xf32, #tpu.memory_space<vmem>>, vector<8x1xf32>
    %151 = vector.extract_strided_slice %116 {offsets = [5, 0], sizes = [1, 128], strides = [1, 1]} : vector<8x128xf32> to vector<1x128xf32>
    %152 = vector.broadcast %150 : vector<8x1xf32> to vector<8x128xf32>
    %153 = vector.broadcast %151 : vector<1x128xf32> to vector<8x128xf32>
    %154 = arith.mulf %152, %153 : vector<8x128xf32>
    %155 = arith.addf %149, %154 : vector<8x128xf32>
    %c0_31 = arith.constant 0 : index
    %c23 = arith.constant 23 : index
    %156 = vector.load %arg2[%c0_31, %c23] : memref<8x128xf32, #tpu.memory_space<vmem>>, vector<8x1xf32>
    %157 = vector.extract_strided_slice %116 {offsets = [6, 0], sizes = [1, 128], strides = [1, 1]} : vector<8x128xf32> to vector<1x128xf32>
    %158 = vector.broadcast %156 : vector<8x1xf32> to vector<8x128xf32>
    %159 = vector.broadcast %157 : vector<1x128xf32> to vector<8x128xf32>
    %160 = arith.mulf %158, %159 : vector<8x128xf32>
    %161 = arith.addf %155, %160 : vector<8x128xf32>
    %c0_32 = arith.constant 0 : index
    %c24 = arith.constant 24 : index
    %162 = vector.load %arg2[%c0_32, %c24] : memref<8x128xf32, #tpu.memory_space<vmem>>, vector<8x1xf32>
    %163 = vector.extract_strided_slice %116 {offsets = [7, 0], sizes = [1, 128], strides = [1, 1]} : vector<8x128xf32> to vector<1x128xf32>
    %164 = vector.broadcast %162 : vector<8x1xf32> to vector<8x128xf32>
    %165 = vector.broadcast %163 : vector<1x128xf32> to vector<8x128xf32>
    %166 = arith.mulf %164, %165 : vector<8x128xf32>
    %167 = arith.addf %161, %166 : vector<8x128xf32>
    %cst_33 = arith.constant 0.000000e+00 : f32
    %168 = vector.broadcast %cst_33 : f32 to vector<8x128xf32>
    %169 = arith.maximumf %167, %168 : vector<8x128xf32>
    %c0_34 = arith.constant 0 : index
    %c25 = arith.constant 25 : index
    %170 = vector.load %arg2[%c0_34, %c25] : memref<8x128xf32, #tpu.memory_space<vmem>>, vector<8x1xf32>
    %171 = vector.broadcast %170 : vector<8x1xf32> to vector<8x128xf32>
    %172 = arith.mulf %171, %169 : vector<8x128xf32>
    %cst_35 = arith.constant dense<0.000000e+00> : vector<128xf32>
    %173 = vector.multi_reduction <add>, %172, %cst_35 [0] : vector<8x128xf32> to vector<128xf32>
    %174 = vector.shape_cast %173 : vector<128xf32> to vector<1x128xf32>
    %c0_36 = arith.constant 0 : index
    %c30 = arith.constant 30 : index
    %175 = vector.load %arg2[%c0_36, %c30] : memref<8x128xf32, #tpu.memory_space<vmem>>, vector<1x1xf32>
    %176 = vector.broadcast %175 : vector<1x1xf32> to vector<1x128xf32>
    %177 = arith.addf %174, %176 : vector<1x128xf32>
    %c0_37 = arith.constant 0 : index
    %c0_38 = arith.constant 0 : index
    %178 = vector.load %arg3[%c0_37, %c0_38] : memref<1x128xf32, #tpu.memory_space<vmem>>, vector<1x128xf32>
    tpu.vector_store %arg3[%c0_37, %c0_38], %177 {strides = array<i32>} : memref<1x128xf32, #tpu.memory_space<vmem>>, vector<1x128xf32>,
    return
  }
  func.func @transform_0(%arg0: i32) -> (i32, i32) {
    %c0_i32 = arith.constant 0 : i32
    %c0_i32_0 = arith.constant 0 : i32
    return %c0_i32, %arg0 : i32, i32
  }
  func.func @transform_1(%arg0: i32) -> (i32, i32) {
    %c0_i32 = arith.constant 0 : i32
    %c0_i32_0 = arith.constant 0 : i32
    %c0_i32_1 = arith.constant 0 : i32
    return %c0_i32, %c0_i32_0 : i32, i32
  }
  func.func @transform_2(%arg0: i32) -> (i32, i32) {
    %c0_i32 = arith.constant 0 : i32
    %c0_i32_0 = arith.constant 0 : i32
    return %c0_i32, %arg0 : i32, i32
  }
}

</mosaic_0001>

<bundles_post_ra>
// kernel: tpu_custom_call.1
= control target key start
LH: loop header
LB: loop body
LE: loop exit
PB: predicated region body
PF: predicated region fallthrough
CT: control target
= control target key end

     0   :  { %7 = vsyncpa [#allocation3], 0  ;;  %s956_s0 = inlined_call_operand.hbm [shape: f32[1,256], index: 0, kind: input, shape index: {}]   ;;  %s957_s1 = inlined_call_operand.hbm [shape: f32[8,128], index: 1, kind: input, shape index: {}]   ;;  %s958_s2 = inlined_call_operand.hbm [shape: f32[1,256], index: 2, kind: output, shape index: {}]  }
   0x1   :  { %9 = vsyncpa [#allocation3 + $0x1], 0 }
   0x2   :  { %10 = vsyncpa [#allocation6], 0 }
   0x3   :  { %11 = vsyncpa [#allocation4], 0 }
   0x4   :  { %13 = vsyncpa [#allocation4 + $0x1], 0  ;;  %s783_s9 = smov 0   ;;  %s785_s10 = smov 0  }
   0x5   :  { %s787_s11 = smov 0   ;;  %s789_s12 = smov 0  }
   0x6 LB: > { %s804_s13 = sadd.s32 4294967295, %s734_s12   ;;  %s475_s14 = sadd.s32 4294967294, %s734_s12   ;;  %s734_s12 = sphi %s789_s12, %s968_s12   ;;  %s730_s11 = sphi %s787_s11, %s967_s11   ;;  %s726_s10 = sphi %s785_s10, %s966_s10   ;;  %s722_s9 = sphi %s783_s9, %s965_s9  }
   0x7   : > { %p39_p0 = scmp.ne.s32.totalorder %s726_s10, %s722_s9  ;;  %p40_p1 = scmp.eq.s32.totalorder %s804_s13, 0 }
   0x8   : > { %p84_p2 = scmp.eq.s32.totalorder %s804_s13, 1  ;;  %p90_p3 = scmp.eq.s32.totalorder %s475_s14, 1 }
   0x9   : > { %p813_p4 = por %p40_p1, %p39_p0  ;;  %p476_p5 = scmp.ge.s32.totalorder %s734_s12, 1 }
   0xa   : > { %p818_p6 = por %p90_p3, %p39_p0  ;;  %p97_p7 = scmp.lt.s32.totalorder %s734_s12, 3 }
   0xb   : > { %s109_s19 = sshll.u32 %s957_s1, 4  ;;  %s736_s21 = smov [#allocation5]   ;;  %s110_s19 = int_to_ptr.hbm [resolvable:$true] %s109_s19 }
   0xc   : > { %p826_p8 = pnand %p476_p5, %p97_p7  ;;  %s111_s22 = sshll.u32 %s736_s21, 4  ;;  %s112_s22 = int_to_ptr.vmem [resolvable:$true] %s111_s22 }
   0xd   : > { %s836_s23 = sadd.s32 1, %s734_s12   ;;  %s26_s24 = sadd.s32 1, %s730_s11 }
   0xe   : > { %p491_p10 = pneg %p826_p8  ;;  %s23_s25 = ssub.s32 %s734_s12, %s836_s23 }
   0xf   : > { %p24_p12 = scmp.eq.s32.totalorder %s23_s25, 0  ;;  %p33_p13 = scmp.ne.s32.totalorder %s730_s11, %s726_s10 }
  0x10   : > { %p492_p11 = pnand %p491_p10, %p40_p1  ;;  %p34_p0 = scmp.eq.s32.totalorder %s734_s12, 0 }
  0x11   : > { %p504_p3 = scmp.lt.s32.totalorder %s734_s12, 2  ;;  %p850_p7 = por %p84_p2, %p33_p13 }
  0x12   : > { %494 = dma.hbm_to_vmem [thread:$0]  (!%p492_p11), %s110_s19, 128, %s112_s22, [#allocation6]  }
  0x13   : > { %s846_s26 = scalar_select %p24_p12, %s730_s11, %s26_s24  }
  0x14   : > { %p35_p5 = por %p34_p0, %p33_p13  ;;  %s122_s28 = sand.u32 1, %s730_s11  }
  0x15   : > { %s128_s3 = scalar_lea.hbm %s956_s0, %s734_s12  ;;  %s125_s5 = scalar_lea.vmem [#allocation2], %s122_s28 }
  0x16   : > { %s130_s4 = sshll.u32 %s128_s3, 4  ;;  %s132_s6 = sshll.u32 %s125_s5, 4  ;;  %s131_s4 = int_to_ptr.hbm [resolvable:$true] %s130_s4  ;;  %s133_s6 = int_to_ptr.vmem [resolvable:$true] %s132_s6 }
  0x17   : > { %p859_p10 = pnand %p504_p3, %p35_p5  ;;  %s123_s8 = scalar_lea.sflag [#allocation3], %s122_s28 }
  0x18   : > { %s634_s14 = sshra.s32 %s131_s4, 4  ;;  %s641_s21 = scalar_lea.hbm %s956_s0, 2  ;;  %s635_s14 = int_to_ptr.hbm [resolvable:$true] %s634_s14 }
  0x19   : > { %s636_s17 = scalar_lea.hbm %s635_s14, 1  ;;  %p638_p11 = pneg %p859_p10 }
  0x1a   : > { %p637_p2 = scmp.ne.s32.totalorder %s635_s14, %s636_s17  ;;  %p642_p0 = scmp.lt.s32.totalorder %s635_s14, %s956_s0 }
  0x1b   : > { %p643_p3 = scmp.lt.s32.totalorder %s641_s21, %s636_s17 }
  0x1c   : > { %p639_p12 = pnand %p638_p11, %p637_p2 }
  0x1d   : > { %p644_p5 = por %p643_p3, %p642_p0 }
  0x1e   : > { %p640_p13 = pneg %p639_p12 }
  0x20   : > { %p645_p9 = pnand %p644_p5, %p640_p13 }
  0x22   : > { %648 = shalt.err (!%p645_p9)
}
  0x23   : > { %498 = dma.hbm_to_vmem [thread:$0]  (!%p859_p10), %s131_s4, 16, %s133_s6, %s123_s8  }
  0x24   : > { %141 = sbr.rel (%p826_p8) target bundleno = 280 (0x118), region = 28  ;;  %s876_s25 = sand.u32 (!%p826_p8), 1, %s726_s10  }
  0x25   : > { %s144_s28 = scalar_lea.sflag (!%p826_p8), [#allocation3], %s876_s25  ;;  %s146_s29 = scalar_lea.vmem (!%p826_p8), [#allocation2], %s876_s25 }
  0x29   : > { %709 = dma.done.wait (%p813_p4), %s144_s28, 16  }
  0x2a   : > { %711 = vsyncadd (%p813_p4), %s144_s28, 4294967280 }
  0x2b   : > { %713 = dma.done.wait (%p40_p1), [#allocation6], 128  }
  0x2c   : > { %715 = vsyncadd (%p40_p1), [#allocation6], 4294967168  ;;  %v737_v0 = vmov 27   ;;  %v738_v1 = vmov 26   ;;  %v739_v2 = vmov 2   ;;  %v888_v3 = vld [vmem:[#allocation5] sm:$0xff]  ;;  %s399_s30 = scalar_lea.hbm %s958_s2, %s804_s13 }
  0x2d   : > { %573 = vset.pattern.permute.xlu1 %v737_v0  ;;  %571 = vset.pattern.permute.xlu0 %v738_v1  ;;  %v740_v4 = vmov 1   ;;  %v741_v5 = vmov 0   ;;  %v742_v6 = vmov 3   ;;  %v743_v7 = vmov 4   ;;  %v382_v33 = vld [vmem:[#allocation5] sm:$0x1] }
  0x2e   : > { %575 = vset.pattern.permute.xlu2 %v739_v2  ;;  %189 = vperm.xlu1 %573, %v888_v3   ;;  %v744_v8 = vmov 6   ;;  %v745_v9 = vmov 5   ;;  %v746_v10 = vmov 7   ;;  %v747_v11 = vmov 10   ;;  %v603_v37 = vld [vmem:[%s146_s29] ss:$0 sm:$0xff] }
  0x2f   : > { %175 = vperm.xlu0 %571, %v888_v3   ;;  %200 = vperm.xlu2 %575, %v888_v3   ;;  %v748_v12 = vmov 8   ;;  %v749_v13 = vmov 28   ;;  %v750_v14 = vmov 15   ;;  %v751_v15 = vmov 9   ;;  %s170_s3 = scalar_lea.vmem [#allocation7], %s876_s25  ;;  %s403_s5 = sshll.u32 %s399_s30, 4  ;;  %s404_s5 = int_to_ptr.hbm [resolvable:$true] %s403_s5 }
  0x30   : > { %v752_v16 = vmov 11   ;;  %v753_v17 = vmov 19   ;;  %v754_v18 = vmov 12   ;;  %v755_v19 = vmov 13   ;;  %s401_s4 = sshll.u32 %s170_s3, 4  ;;  %s391_s6 = scalar_lea.sflag [#allocation4], %s876_s25  ;;  %s402_s4 = int_to_ptr.vmem [resolvable:$true] %s401_s4 }
  0x31   : > { %v756_v20 = vmov 24   ;;  %v757_v21 = vmov 14   ;;  %v758_v22 = vmov 16   ;;  %v759_v23 = vmov 17   ;;  %s678_s7 = sshra.s32 %s404_s5, 4  ;;  %s684_s17 = scalar_lea.hbm %s958_s2, 2  ;;  %s679_s7 = int_to_ptr.hbm [resolvable:$true] %s678_s7 }
  0x32   : > { %v760_v24 = vmov 29   ;;  %v761_v25 = vmov 18   ;;  %v762_v26 = vmov 20   ;;  %v763_v27 = vmov 21   ;;  %s680_s8 = scalar_lea.hbm %s679_s7, 1  ;;  %p685_p9 = scmp.lt.s32.totalorder %s679_s7, %s958_s2 }
  0x33   : > { %v764_v28 = vmov 22   ;;  %v765_v29 = vmov 23   ;;  %v766_v30 = vmov 25   ;;  %v767_v32 = vmov 30   ;;  %p681_p1 = scmp.ne.s32.totalorder %s679_s7, %s680_s8  ;;  %p686_p10 = scmp.lt.s32.totalorder %s684_s17, %s680_s8 }
  0x35   : > { %p682_p4 = pnand %p681_p1, %p850_p7  ;;  %p687_p2 = por %p686_p10, %p685_p9 }
  0x36   : > { %574 = vset.pattern.permute.xlu1 %v740_v4 }
  0x37   : > { %572 = vset.pattern.permute.xlu0 %v741_v5  ;;  %193 = vperm.xlu1 %574, %v888_v3   ;;  %p683_p8 = pneg %p682_p4 }
  0x38   : > { %179 = vperm.xlu0 %572, %v888_v3   ;;  %576 = vset.pattern.permute.xlu2 %v742_v6 }
  0x39   : > { %207 = vperm.xlu2 %576, %v888_v3   ;;  %p688_p11 = pnand %p687_p2, %p683_p8 }
  0x3f   : > { %577 = vset.pattern.permute.xlu1 %v743_v7 }
  0x40   : > { %579 = vset.pattern.permute.xlu0 %v744_v8  ;;  %214 = vperm.xlu1 %577, %v888_v3  }
  0x41   : > { %228 = vperm.xlu0 %579, %v888_v3   ;;  %578 = vset.pattern.permute.xlu2 %v745_v9 }
  0x42   : > { %221 = vperm.xlu2 %578, %v888_v3  }
  0x48   : > { %580 = vset.pattern.permute.xlu1 %v746_v10 }
  0x49   : > { %584 = vset.pattern.permute.xlu0 %v747_v11  ;;  %235 = vperm.xlu1 %580, %v888_v3  }
  0x4a   : > { %261 = vperm.xlu0 %584, %v888_v3   ;;  %581 = vset.pattern.permute.xlu2 %v748_v12 }
  0x4b   : > { %242 = vperm.xlu2 %581, %v888_v3  }
  0x51   : > { %582 = vset.pattern.permute.xlu1 %v749_v13 }
  0x52   : > { %589 = vset.pattern.permute.xlu0 %v750_v14  ;;  %250 = vperm.xlu1 %582, %v888_v3  }
  0x53   : > { %296 = vperm.xlu0 %589, %v888_v3   ;;  %583 = vset.pattern.permute.xlu2 %v751_v15 }
  0x54   : > { %254 = vperm.xlu2 %583, %v888_v3  }
  0x5a   : > { %585 = vset.pattern.permute.xlu1 %v752_v16 }
  0x5b   : > { %594 = vset.pattern.permute.xlu0 %v753_v17  ;;  %268 = vperm.xlu1 %585, %v888_v3  }
  0x5c   : > { %329 = vperm.xlu0 %594, %v888_v3   ;;  %586 = vset.pattern.permute.xlu2 %v754_v18 }
  0x5d   : > { %275 = vperm.xlu2 %586, %v888_v3  }
  0x63   : > { %587 = vset.pattern.permute.xlu1 %v755_v19 }
  0x64   : > { %599 = vset.pattern.permute.xlu0 %v756_v20  ;;  %282 = vperm.xlu1 %587, %v888_v3  }
  0x65   : > { %364 = vperm.xlu0 %599, %v888_v3   ;;  %588 = vset.pattern.permute.xlu2 %v757_v21 }
  0x66   : > { %289 = vperm.xlu2 %588, %v888_v3  }
  0x6c   : > { %590 = vset.pattern.permute.xlu1 %v758_v22 }
  0x6d   : > { %303 = vperm.xlu1 %590, %v888_v3   ;;  %602 = vset.pattern.permute.xlu0 %v767_v32 }
  0x6e   : > { %591 = vset.pattern.permute.xlu2 %v759_v23 }
  0x6f   : > { %315 = vperm.xlu2 %591, %v888_v3  }
  0x75   : > { %592 = vset.pattern.permute.xlu1 %v760_v24 }
  0x76   : > { %311 = vperm.xlu1 %592, %v888_v3  }
  0x77   : > { %593 = vset.pattern.permute.xlu2 %v761_v25 }
  0x78   : > { %322 = vperm.xlu2 %593, %v888_v3  }
  0x7e   : > { %595 = vset.pattern.permute.xlu1 %v762_v26 }
  0x7f   : > { %336 = vperm.xlu1 %595, %v888_v3  }
  0x80   : > { %596 = vset.pattern.permute.xlu2 %v763_v27 }
  0x81   : > { %343 = vperm.xlu2 %596, %v888_v3  }
  0x87   : > { %597 = vset.pattern.permute.xlu1 %v764_v28 }
  0x88   : > { %350 = vperm.xlu1 %597, %v888_v3  }
  0x89   : > { %598 = vset.pattern.permute.xlu2 %v765_v29  ;;  %v201_v31 = vpop.permute.xlu2 %200 }
  0x8a   : > { %357 = vperm.xlu2 %598, %v888_v3  }
  0x90   : > { %600 = vset.pattern.permute.xlu1 %v766_v30 }
  0x91   : > { %372 = vperm.xlu1 %600, %v888_v3  }
  0x92   : > { %601 = vset.pattern.permute.xlu2 %v767_v32 }
  0x93   : > { %385 = vperm.xlu2 %601, %v382_v33   ;;  %v208_v34 = vpop.permute.xlu2 %207 }
  0x9c   : > { %v222_v40 = vpop.permute.xlu2 %221 }
  0xa0   : > { %v190_v35 = vpop.permute.xlu1 %189 }
  0xa1   : > { %v176_v36 = vpop.permute.xlu0 %175 }
  0xa5   : > { %v243_v49 = vpop.permute.xlu2 %242 }
  0xa9   : > { %v194_v38 = vpop.permute.xlu1 %193 }
  0xaa   : > { %v180_v39 = vpop.permute.xlu0 %179 }
  0xab   : > { %v185_v41 = vmul.f32 %v603_v37, %v180_v39 }
  0xad   : > { %v186_v42 = vadd.f32 %v185_v41, %v176_v36 }
  0xae   : > { %v255_v3 = vpop.permute.xlu2 %254 }
  0xaf   : > { %v187_v43 = vmax.f32 %v186_v42, 0.0 }
  0xb1   : > { %v196_v44 = vperm.slane %v187_v43, 0  ;;  %v203_v45 = vperm.slane %v187_v43, 1  ;;  %v210_v48 = vperm.slane %v187_v43, 2  ;;  %v217_v52 = vperm.slane %v187_v43, 3 }
  0xb2   : > { %v215_v46 = vpop.permute.xlu1 %214  ;;  %v224_v55 = vperm.slane %v187_v43, 4  ;;  %v231_v58 = vperm.slane %v187_v43, 5  ;;  %v245_v63 = vperm.slane %v187_v43, 7  ;;  %v238_v2 = vperm.slane %v187_v43, 6 }
  0xb3   : > { %v197_v47 = vmul.f32 %v196_v44, %v194_v38  ;;  %v204_v51 = vmul.f32 %v203_v45, %v201_v31  ;;  %v211_v54 = vmul.f32 %v210_v48, %v208_v34  ;;  %v218_v57 = vmul.f32 %v217_v52, %v215_v46  ;;  %v229_v61 = vpop.permute.xlu0 %228 }
  0xb4   : > { %v225_v60 = vmul.f32 %v224_v55, %v222_v40  ;;  %v232_v1 = vmul.f32 %v231_v58, %v229_v61  ;;  %v246_v6 = vmul.f32 %v245_v63, %v243_v49 }
  0xb5   : > { %v198_v50 = vadd.f32 %v197_v47, %v190_v35 }
  0xb7   : > { %v205_v53 = vadd.f32 %v204_v51, %v198_v50  ;;  %v276_v12 = vpop.permute.xlu2 %275 }
  0xb9   : > { %v212_v56 = vadd.f32 %v211_v54, %v205_v53 }
  0xbb   : > { %v219_v59 = vadd.f32 %v218_v57, %v212_v56  ;;  %v236_v62 = vpop.permute.xlu1 %235 }
  0xbc   : > { %v239_v5 = vmul.f32 %v238_v2, %v236_v62  ;;  %v262_v18 = vpop.permute.xlu0 %261 }
  0xbd   : > { %v226_v0 = vadd.f32 %v225_v60, %v219_v59 }
  0xbf   : > { %v233_v4 = vadd.f32 %v232_v1, %v226_v0 }
  0xc0   : > { %v290_v23 = vpop.permute.xlu2 %289 }
  0xc1   : > { %v240_v7 = vadd.f32 %v239_v5, %v233_v4 }
  0xc3   : > { %v247_v8 = vadd.f32 %v246_v6, %v240_v7 }
  0xc4   : > { %v251_v10 = vpop.permute.xlu1 %250 }
  0xc5   : > { %v248_v9 = vmax.f32 %v247_v8, 0.0  ;;  %v297_v34 = vpop.permute.xlu0 %296 }
  0xc7   : > { %v257_v11 = vperm.slane %v248_v9, 0  ;;  %v264_v14 = vperm.slane %v248_v9, 1  ;;  %v271_v17 = vperm.slane %v248_v9, 2  ;;  %v278_v21 = vperm.slane %v248_v9, 3 }
  0xc8   : > { %v285_v26 = vperm.slane %v248_v9, 4  ;;  %v292_v27 = vperm.slane %v248_v9, 5  ;;  %v299_v33 = vperm.slane %v248_v9, 6  ;;  %v306_v38 = vperm.slane %v248_v9, 7 }
  0xc9   : > { %v258_v13 = vmul.f32 %v257_v11, %v255_v3  ;;  %v265_v19 = vmul.f32 %v264_v14, %v262_v18  ;;  %v279_v25 = vmul.f32 %v278_v21, %v276_v12  ;;  %v316_v35 = vpop.permute.xlu2 %315 }
  0xca   : > { %v293_v32 = vmul.f32 %v292_v27, %v290_v23  ;;  %v300_v37 = vmul.f32 %v299_v33, %v297_v34 }
  0xcb   : > { %v259_v15 = vadd.f32 %v258_v13, %v251_v10 }
  0xcd   : > { %v269_v16 = vpop.permute.xlu1 %268  ;;  %v266_v22 = vadd.f32 %v265_v19, %v259_v15 }
  0xce   : > { %v272_v20 = vmul.f32 %v271_v17, %v269_v16  ;;  %v330_v56 = vpop.permute.xlu0 %329 }
  0xd0   : > { %v273_v24 = vadd.f32 %v272_v20, %v266_v22 }
  0xd2   : > { %v280_v29 = vadd.f32 %v279_v25, %v273_v24  ;;  %v323_v44 = vpop.permute.xlu2 %322 }
  0xd6   : > { %v283_v28 = vpop.permute.xlu1 %282 }
  0xd7   : > { %v286_v30 = vmul.f32 %v285_v26, %v283_v28  ;;  %v365_v6 = vpop.permute.xlu0 %364 }
  0xd9   : > { %v287_v31 = vadd.f32 %v286_v30, %v280_v29 }
  0xdb   : > { %v294_v36 = vadd.f32 %v293_v32, %v287_v31  ;;  %v344_v52 = vpop.permute.xlu2 %343 }
  0xdd   : > { %v301_v40 = vadd.f32 %v300_v37, %v294_v36 }
  0xdf   : > { %v304_v39 = vpop.permute.xlu1 %303 }
  0xe0   : > { %v307_v41 = vmul.f32 %v306_v38, %v304_v39 }
  0xe2   : > { %v308_v42 = vadd.f32 %v307_v41, %v301_v40 }
  0xe4   : > { %v309_v43 = vmax.f32 %v308_v42, 0.0  ;;  %v358_v1 = vpop.permute.xlu2 %357 }
  0xe6   : > { %v318_v45 = vperm.slane %v309_v43, 0  ;;  %v325_v48 = vperm.slane %v309_v43, 1  ;;  %v332_v50 = vperm.slane %v309_v43, 2  ;;  %v339_v55 = vperm.slane %v309_v43, 3 }
  0xe7   : > { %v346_v60 = vperm.slane %v309_v43, 4  ;;  %v360_v62 = vperm.slane %v309_v43, 6  ;;  %v353_v0 = vperm.slane %v309_v43, 5  ;;  %v367_v3 = vperm.slane %v309_v43, 7 }
  0xe8   : > { %v312_v46 = vpop.permute.xlu1 %311  ;;  %v319_v47 = vmul.f32 %v318_v45, %v316_v35  ;;  %v326_v51 = vmul.f32 %v325_v48, %v323_v44  ;;  %v333_v57 = vmul.f32 %v332_v50, %v330_v56 }
  0xe9   : > { %v347_v63 = vmul.f32 %v346_v60, %v344_v52  ;;  %v361_v7 = vmul.f32 %v360_v62, %v358_v1  ;;  %v368_v9 = vmul.f32 %v367_v3, %v365_v6 }
  0xea   : > { %v320_v49 = vadd.f32 %v319_v47, %v312_v46 }
  0xec   : > { %v327_v53 = vadd.f32 %v326_v51, %v320_v49 }
  0xed   : > { %v386_v20 = vpop.permute.xlu2 %385 }
  0xee   : > { %v334_v59 = vadd.f32 %v333_v57, %v327_v53 }
  0xf1   : > { %v337_v54 = vpop.permute.xlu1 %336 }
  0xf2   : > { %v340_v58 = vmul.f32 %v339_v55, %v337_v54 }
  0xf4   : > { %v341_v61 = vadd.f32 %v340_v58, %v334_v59 }
  0xf6   : > { %v348_v4 = vadd.f32 %v347_v63, %v341_v61 }
  0xfa   : > { %v351_v2 = vpop.permute.xlu1 %350 }
  0xfb   : > { %v354_v5 = vmul.f32 %v353_v0, %v351_v2 }
  0xfd   : > { %v355_v8 = vadd.f32 %v354_v5, %v348_v4 }
  0xff   : > { %v362_v10 = vadd.f32 %v361_v7, %v355_v8 }
 0x101   : > { %v369_v11 = vadd.f32 %v368_v9, %v362_v10 }
 0x103   : > { %v373_v12 = vpop.permute.xlu1 %372  ;;  %v370_v13 = vmax.f32 %v369_v11, 0.0 }
 0x105   : > { %v375_v14 = vmul.f32 %v373_v12, %v370_v13 }
 0x107   : > { %v376_v15 = vrot.slane %v375_v14, 4 }
 0x109   : > { %v377_v16 = vadd.f32 %v376_v15, %v375_v14 }
 0x10b   : > { %v378_v17 = vrot.slane %v377_v16, 2 }
 0x10d   : > { %v379_v18 = vadd.f32 %v378_v17, %v377_v16 }
 0x10f   : > { %v380_v19 = vrot.slane %v379_v18, 1 }
 0x111   : > { %v381_v21 = vadd.f32 %v380_v19, %v379_v18 }
 0x113   : > { %v388_v22 = vadd.f32 %v386_v20, %v381_v21 }
 0x115   : > { %389 = vst [vmem:[%s170_s3] sm:$0x1] %v388_v22 }
 0x116   : > { %691 = shalt.err (!%p688_p11)
}
 0x117   : > { %489 = dma.vmem_to_hbm [thread:$0]  (%p850_p7), %s402_s4, 16, %s404_s5, %s391_s6  }
 0x118 PF: > { %s415_s21 = sand.u32 1, %s722_s9   ;;  %p964_p12 = scmp.ge.s32.totalorder %s734_s12, 2 }
 0x119   : > { %s416_s22 = scalar_lea.sflag [#allocation4], %s415_s21 }
 0x11a   : > { %p500_p13 = pnand %p964_p12, %p818_p6 }
 0x11c   : > { %p501_p0 = pneg %p500_p13 }
 0x11e   : > { %717 = dma.done.wait (%p501_p0), %s416_s22, 16  }
 0x11f   : > { %719 = vsyncadd (%p501_p0), %s416_s22, 4294967280  ;;  %p16_p3 = scmp.ge.s32.totalorder %s836_s23, 4   ;;  %s965_s9 = smov %s726_s10 }
 0x120   : > { %s966_s10 = smov %s730_s11  ;;  %s967_s11 = smov %s846_s26 }
 0x121   : > { %s968_s12 = smov %s836_s23  ;;  %18 = sbr.rel (!%p16_p3) target bundleno = 6 (0x6), region = 77 }
 0x126   :  { %421 = vsyncpa [#allocation3], 1 }
 0x127   :  { %423 = vsyncpa [#allocation3 + $0x1], 1 }
 0x128   :  { %424 = vsyncpa [#allocation6], 1 }
 0x129   :  { %425 = vsyncpa [#allocation4], 1 }
 0x12a   :  { %427 = vsyncpa [#allocation4 + $0x1], 1 }

</bundles_post_ra>
